<compile_context>
chip_gen: v7x
topology: tpu7x:2x2x1
jax: 0.10.0
libtpu: 0.0.40
codegen_flags: <defaults>
</compile_context>

<pallas_src>
import functools
import math

import jax
import jax.numpy as jnp
from jax.experimental import pallas as pl
from jax.experimental.pallas import tpu as pltpu

VMEM_SPEC = pl.BlockSpec(memory_space=pltpu.MemorySpace.VMEM)
VMEM_LIMIT = 48 * 1024 * 1024  # headroom under v7x's 64 MiB physical VMEM


def _tile(dim, cap, base):
    """Largest multiple of `base` <= cap that divides dim, else the full dim."""
    t = min(cap, dim)
    t = (t // base) * base
    while t >= base:
        if dim % t == 0:
            return t
        t -= base
    return dim


def _activate(y, act):
    if act == "relu":
        return jnp.maximum(y, 0.0)
    if act == "gelu":
        # TODO(synk): BERT uses exact erf-GELU; tanh approximation used here.
        return jax.nn.gelu(y, approximate=True)
    if act == "tanh":
        return jnp.tanh(y)
    return y


def _layernorm(y, gamma, beta, eps):
    mu = jnp.mean(y, axis=-1, keepdims=True)
    var = jnp.mean((y - mu) * (y - mu), axis=-1, keepdims=True)
    return (y - mu) * jax.lax.rsqrt(var + eps) * gamma + beta


# ------------------- fused attention block (per batch element) ------------------- #
def _attn_block_kernel(x_ref, qkvw_ref, qkvb_ref, ow_ref, ob_ref, mask_ref,
                       g_ref, bt_ref, o_ref, *, n_heads, d_head, eps):
    x = x_ref[...]                                                     # (S, D) bf16
    D = n_heads * d_head
    # QKV projection (softmax scale already folded into the Q weight slice).
    qkv = (jnp.dot(x, qkvw_ref[...], preferred_element_type=jnp.float32)
           + qkvb_ref[...]).astype(x.dtype)                            # (S, 3D)
    mask = mask_ref[...][0]                                            # (1, S) f32
    bias = (1.0 - mask) * (-1e30)
    # TODO(synk): for very long S, stream K/V tiles with an online softmax instead
    # of materialising the per-head (S, S) score matrix.
    ctx = []
    for h in range(n_heads):
        q = qkv[:, h * d_head:(h + 1) * d_head]
        k = qkv[:, D + h * d_head:D + (h + 1) * d_head]
        v = qkv[:, 2 * D + h * d_head:2 * D + (h + 1) * d_head]
        s = jnp.dot(q, k.T, preferred_element_type=jnp.float32) + bias
        m = jnp.max(s, axis=-1, keepdims=True)
        p = jnp.exp(s - m)
        l = jnp.sum(p, axis=-1, keepdims=True)
        p = p * pl.reciprocal(l, approx=True)
        ctx.append(jnp.dot(p.astype(x.dtype), v, preferred_element_type=jnp.float32))
    ctx = jnp.concatenate(ctx, axis=-1).astype(x.dtype)                # (S, D)
    # Output projection + residual + LayerNorm.
    y = (jnp.dot(ctx, ow_ref[...], preferred_element_type=jnp.float32)
         + ob_ref[...] + x.astype(jnp.float32))
    o_ref[...] = _layernorm(y, g_ref[...], bt_ref[...], eps).astype(o_ref.dtype)


def attn_block(x, mask_b1s, lp, B, S, n_heads, eps):
    D = x.shape[-1]
    d_head = D // n_heads
    return pl.pallas_call(
        functools.partial(_attn_block_kernel, n_heads=n_heads, d_head=d_head, eps=eps),
        out_shape=jax.ShapeDtypeStruct((B * S, D), jnp.bfloat16),
        grid_spec=pltpu.PrefetchScalarGridSpec(
            num_scalar_prefetch=0,
            grid=(B,),
            in_specs=[
                pl.BlockSpec((S, D), lambda b: (b, 0)),
                pl.BlockSpec((D, 3 * D), lambda b: (0, 0)),   # weights: resident
                pl.BlockSpec((1, 3 * D), lambda b: (0, 0)),
                pl.BlockSpec((D, D), lambda b: (0, 0)),
                pl.BlockSpec((1, D), lambda b: (0, 0)),
                pl.BlockSpec((1, 1, S), lambda b: (b, 0, 0)),  # per-batch pad mask
                pl.BlockSpec((1, D), lambda b: (0, 0)),
                pl.BlockSpec((1, D), lambda b: (0, 0)),
            ],
            out_specs=pl.BlockSpec((S, D), lambda b: (b, 0)),
        ),
        compiler_params=pltpu.CompilerParams(
            dimension_semantics=("parallel",),
            vmem_limit_bytes=VMEM_LIMIT),
    )(x, lp["qkv_w"], lp["qkv_b"], lp["o_w"], lp["o_b"], mask_b1s,
      lp["ln1_g"], lp["ln1_b"])


# ----------------------------- fused FFN block ----------------------------------- #
def _ffn_ln_kernel(x_ref, w1_ref, b1_ref, w2_ref, b2_ref, g_ref, bt_ref, o_ref,
                   *, act, eps):
    x = x_ref[...]
    h = jnp.dot(x, w1_ref[...], preferred_element_type=jnp.float32) + b1_ref[...]
    h = _activate(h, act)
    y = jnp.dot(h.astype(w2_ref.dtype), w2_ref[...],
                preferred_element_type=jnp.float32) + b2_ref[...]
    y = y + x.astype(jnp.float32)
    o_ref[...] = _layernorm(y, g_ref[...], bt_ref[...], eps).astype(o_ref.dtype)


def ffn_block(x, lp, act, eps):
    """out = LayerNorm(x + act(x @ w1 + b1) @ w2 + b2) — weights resident over row tiles."""
    M, D = x.shape
    F = lp["f1_w"].shape[1]
    tm = _tile(M, 256, 8)
    return pl.pallas_call(
        functools.partial(_ffn_ln_kernel, act=act, eps=eps),
        out_shape=jax.ShapeDtypeStruct((M, D), jnp.bfloat16),
        grid_spec=pltpu.PrefetchScalarGridSpec(
            num_scalar_prefetch=0,
            grid=(M // tm,),
            in_specs=[
                pl.BlockSpec((tm, D), lambda i: (i, 0)),
                pl.BlockSpec((D, F), lambda i: (0, 0)),
                pl.BlockSpec((1, F), lambda i: (0, 0)),
                pl.BlockSpec((F, D), lambda i: (0, 0)),
                pl.BlockSpec((1, D), lambda i: (0, 0)),
                pl.BlockSpec((1, D), lambda i: (0, 0)),
                pl.BlockSpec((1, D), lambda i: (0, 0)),
            ],
            out_specs=pl.BlockSpec((tm, D), lambda i: (i, 0)),
        ),
        compiler_params=pltpu.CompilerParams(
            dimension_semantics=("parallel",),
            vmem_limit_bytes=VMEM_LIMIT),
    )(x, lp["f1_w"], lp["f1_b"], lp["f2_w"], lp["f2_b"], lp["ln2_g"], lp["ln2_b"])


# --------------------------------- embeddings ------------------------------------ #
def _embed_ln_kernel(e_ref, p_ref, g_ref, b_ref, o_ref, *, eps):
    y = e_ref[...].astype(jnp.float32) + p_ref[...].astype(jnp.float32)
    o_ref[...] = _layernorm(y, g_ref[...], b_ref[...], eps).astype(o_ref.dtype)


def embed_layernorm(emb, pos, gamma, beta, B, S, eps):
    D = emb.shape[-1]
    return pl.pallas_call(
        functools.partial(_embed_ln_kernel, eps=eps),
        out_shape=jax.ShapeDtypeStruct((B * S, D), jnp.bfloat16),
        grid_spec=pltpu.PrefetchScalarGridSpec(
            num_scalar_prefetch=0,
            grid=(B,),
            in_specs=[
                pl.BlockSpec((S, D), lambda b: (b, 0)),
                pl.BlockSpec((S, D), lambda b: (0, 0)),   # position table shared over batch
                pl.BlockSpec((1, D), lambda b: (0, 0)),
                pl.BlockSpec((1, D), lambda b: (0, 0)),
            ],
            out_specs=pl.BlockSpec((S, D), lambda b: (b, 0)),
        ),
        compiler_params=pltpu.CompilerParams(dimension_semantics=("parallel",)),
    )(emb, pos, gamma, beta)


# ------------------------------ classifier tails --------------------------------- #
def _expert_head_kernel(cls_ref, w_ref, b_ref, o_ref):
    o_ref[...] = (jnp.dot(cls_ref[...], w_ref[...],
                          preferred_element_type=jnp.float32) + b_ref[...])


def expert_head(cls_vec, w, b):
    B, C = cls_vec.shape[0], w.shape[1]
    return pl.pallas_call(
        _expert_head_kernel,
        out_shape=jax.ShapeDtypeStruct((B, C), jnp.float32),
        in_specs=[VMEM_SPEC, VMEM_SPEC, VMEM_SPEC],
        out_specs=VMEM_SPEC,
    )(cls_vec, w, b)


def _shared_head_kernel(cls_ref, wp_ref, bp_ref, wc_ref, bc_ref, o_ref):
    pooled = jnp.tanh(jnp.dot(cls_ref[...], wp_ref[...],
                              preferred_element_type=jnp.float32) + bp_ref[...])
    o_ref[...] = (jnp.dot(pooled.astype(wc_ref.dtype), wc_ref[...],
                          preferred_element_type=jnp.float32) + bc_ref[...])


def shared_head(cls_vec, w_pool, b_pool, w_cls, b_cls):
    B, C = cls_vec.shape[0], w_cls.shape[1]
    return pl.pallas_call(
        _shared_head_kernel,
        out_shape=jax.ShapeDtypeStruct((B, C), jnp.float32),
        in_specs=[VMEM_SPEC] * 5,
        out_specs=VMEM_SPEC,
    )(cls_vec, w_pool, b_pool, w_cls, b_cls)


def _combine_loss_kernel(*refs, n_views, log_w, with_ce):
    logit_refs = refs[:n_views]
    dl_ref = refs[n_views]
    y_ref = refs[n_views + 1]
    preds_ref = refs[n_views + 2]
    loss_ref = refs[n_views + 3]

    def log_softmax(z):
        m = jnp.max(z, axis=-1, keepdims=True)
        return z - (jnp.log(jnp.sum(jnp.exp(z - m), axis=-1, keepdims=True)) + m)

    # log preds = logsumexp_k( log w_k + log_softmax(logits_k) )  (numerically stable)
    a = [log_softmax(logit_refs[i][...]) + log_w[i] for i in range(n_views)]
    amax = a[0]
    for t in a[1:]:
        amax = jnp.maximum(amax, t)
    ssum = jnp.zeros_like(amax)
    for t in a:
        ssum = ssum + jnp.exp(t - amax)
    log_preds = amax + jnp.log(ssum)
    preds_ref[...] = jnp.exp(log_preds)

    y = y_ref[...]
    nll = -jnp.sum(log_preds * y, axis=-1, keepdims=True)              # (B, 1)
    if with_ce:
        dl = dl_ref[...]
        md = jnp.max(dl, axis=-1, keepdims=True)
        lse = jnp.log(jnp.sum(jnp.exp(dl - md), axis=-1, keepdims=True)) + md
        ce = lse - jnp.sum(dl * y, axis=-1, keepdims=True)             # (B, 1)
    else:
        ce = jnp.zeros_like(nll)
    B = y.shape[0]
    loss_ref[...] = jnp.sum(0.5 * nll + 0.5 * ce, axis=0, keepdims=True) / B


def combine_and_loss(logits_list, domain_logits, labels_onehot, with_ce):
    K = len(logits_list)
    log_w = tuple(float(math.log(1.0 / K)) for _ in range(K))
    B, C = logits_list[0].shape
    preds, loss = pl.pallas_call(
        functools.partial(_combine_loss_kernel, n_views=K, log_w=log_w, with_ce=with_ce),
        out_shape=(jax.ShapeDtypeStruct((B, C), jnp.float32),
                   jax.ShapeDtypeStruct((1, 1), jnp.float32)),
        in_specs=[VMEM_SPEC] * (K + 2),
        out_specs=(VMEM_SPEC, VMEM_SPEC),
    )(*logits_list, domain_logits, labels_onehot)
    return preds, loss


# -------------------------------- encoder stack ----------------------------------- #
def encoder_forward(emb_p, layer_ps, input_ids, attention_mask, cfg, act,
                    emb_eps, layer_eps):
    B, S = input_ids.shape
    # token-id gather is data-dependent -> JAX glue; everything else in Pallas.
    emb = jnp.take(emb_p["word_emb"], input_ids.reshape(-1), axis=0)   # (B*S, D) f32
    pos = emb_p["pos_emb"][:S]
    x = embed_layernorm(emb, pos, emb_p["ln_g"], emb_p["ln_b"], B, S, emb_eps)
    mask_b1s = attention_mask.astype(jnp.float32).reshape(B, 1, S)
    for lp in layer_ps:
        x = attn_block(x, mask_b1s, lp, B, S, cfg["heads"], layer_eps)
        x = ffn_block(x, lp, act, layer_eps)
    return x                                                           # (B*S, D) bf16


# ------------------------------- parameter init ----------------------------------- #
def _dense(key, fan_in, fan_out):
    w = jax.random.normal(key, (fan_in, fan_out), jnp.float32) * 0.02
    return w.astype(jnp.bfloat16), jnp.zeros((1, fan_out), jnp.float32)


def init_embeddings(key, cfg):
    D = cfg["hidden"]
    k0, k1 = jax.random.split(key, 2)
    return {
        "word_emb": jax.random.normal(k0, (cfg["vocab"], D), jnp.float32) * 0.02,
        "pos_emb": jax.random.normal(k1, (cfg["max_pos"], D), jnp.float32) * 0.02,
        "ln_g": jnp.ones((1, D), jnp.float32),
        "ln_b": jnp.zeros((1, D), jnp.float32),
    }


def init_layer(key, D, F, H):
    ks = jax.random.split(key, 4)
    d_head = D // H
    qkv_w = jax.random.normal(ks[0], (D, 3 * D), jnp.float32) * 0.02
    qkv_w = qkv_w.at[:, :D].multiply(1.0 / math.sqrt(d_head))   # fold softmax scale into Q
    lp = {"qkv_w": qkv_w.astype(jnp.bfloat16),
          "qkv_b": jnp.zeros((1, 3 * D), jnp.float32)}
    lp["o_w"], lp["o_b"] = _dense(ks[1], D, D)
    lp["f1_w"], lp["f1_b"] = _dense(ks[2], D, F)
    lp["f2_w"], lp["f2_b"] = _dense(ks[3], F, D)
    lp["ln1_g"], lp["ln1_b"] = jnp.ones((1, D), jnp.float32), jnp.zeros((1, D), jnp.float32)
    lp["ln2_g"], lp["ln2_b"] = jnp.ones((1, D), jnp.float32), jnp.zeros((1, D), jnp.float32)
    return lp


def init_params(key, cfg, n_domains):
    D, F, C, H, L = cfg["hidden"], cfg["ffn"], cfg["n_classes"], cfg["heads"], cfg["layers"]
    keys = jax.random.split(key, 4 + 2 * n_domains)
    k_emb, k_sh_emb, k_sh_layers, k_sh_head = keys[0], keys[1], keys[2], keys[3]
    k_exp_layers = keys[4:4 + n_domains]
    k_exp_cls = keys[4 + n_domains:4 + 2 * n_domains]

    # NOTE: the spec's experts are DISTINCT TransformerEncoders (separate params),
    # so each domain really needs its own forward pass; only the embeddings are shared.
    experts = [{"layers": [init_layer(k, D, F, H) for k in jax.random.split(kd, L)]}
               for kd in k_exp_layers]
    expert_cls = []
    for kd in k_exp_cls:
        w, b = _dense(kd, D, C)
        expert_cls.append({"w": w, "b": b})

    kp, kc = jax.random.split(k_sh_head, 2)
    pool_w, pool_b = _dense(kp, D, D)
    cls_w, cls_b = _dense(kc, D, C)
    shared = {
        "emb": init_embeddings(k_sh_emb, cfg),
        "layers": [init_layer(k, D, F, H) for k in jax.random.split(k_sh_layers, L)],
        "pool_w": pool_w, "pool_b": pool_b, "cls_w": cls_w, "cls_b": cls_b,
    }
    return {"expert_emb": init_embeddings(k_emb, cfg),
            "experts": experts, "expert_cls": expert_cls, "shared": shared}


# -------------------------- multi-view forward (the spec) -------------------------- #
def multi_view_forward(params, input_ids, attention_mask, domains=None, labels=None, *, cfg):
    B, S = input_ids.shape
    D = cfg["hidden"]
    n_domains = len(params["experts"])

    # multi_xformer: shared embeddings, per-domain transformer, pooled = token 0.
    logits_private = []
    for d in range(n_domains):
        h = encoder_forward(params["expert_emb"], params["experts"][d]["layers"],
                            input_ids, attention_mask, cfg,
                            act="relu", emb_eps=1e-12, layer_eps=1e-5)
        cls = h.reshape(B, S, D)[:, 0, :]                     # "output[0]" pooling
        logits_private.append(expert_head(cls, params["expert_cls"][d]["w"],
                                          params["expert_cls"][d]["b"]))

    # shared BERT classifier (encoder + tanh pooler + classifier).
    h_sh = encoder_forward(params["shared"]["emb"], params["shared"]["layers"],
                           input_ids, attention_mask, cfg,
                           act="gelu", emb_eps=1e-12, layer_eps=1e-12)
    cls_sh = h_sh.reshape(B, S, D)[:, 0, :]
    logits_shared = shared_head(cls_sh, params["shared"]["pool_w"], params["shared"]["pool_b"],
                                params["shared"]["cls_w"], params["shared"]["cls_b"])

    # TODO(synk): training branch of the spec drops the selected domain's view;
    # we implement the eval branch (all private views + shared, fixed weights).
    logits_all = logits_private + [logits_shared]

    with_ce = (domains is not None) and (labels is not None)
    if labels is not None:
        y = jax.nn.one_hot(labels, cfg["n_classes"], dtype=jnp.float32)
    else:
        y = jnp.zeros((B, cfg["n_classes"]), jnp.float32)
    domain_logits = logits_private[int(domains[0])] if domains is not None else logits_shared

    preds, loss2d = combine_and_loss(logits_all, domain_logits, y, with_ce)
    if labels is not None:
        return (loss2d[0, 0], preds)
    return (preds,)


# -------------------------------------- main --------------------------------------- #
if __name__ == "__main__":
    cfg = dict(vocab=100, max_pos=16, hidden=32, heads=4, ffn=64, layers=2, n_classes=2)
    B, S, n_domains = 2, 8, 2

    key = jax.random.PRNGKey(0)
    k_params, k_ids, k_lab = jax.random.split(key, 3)

    params = init_params(k_params, cfg, n_domains)
    input_ids = jax.random.randint(k_ids, (B, S), 0, cfg["vocab"], dtype=jnp.int32)
    attention_mask = jnp.array([[1, 1, 1, 1, 1, 1, 0, 0],
                                [1, 1, 1, 1, 1, 1, 1, 1]], dtype=jnp.int32)
    domains = jnp.array([1, 0], dtype=jnp.int32)
    labels = jax.random.randint(k_lab, (B,), 0, cfg["n_classes"], dtype=jnp.int32)

    loss, preds = multi_view_forward(params, input_ids, attention_mask,
                                     domains=domains, labels=labels, cfg=cfg)
    jax.block_until_ready((loss, preds))
    assert preds.shape == (B, cfg["n_classes"]) and loss.shape == ()
    assert bool(jnp.isfinite(loss)) and bool(jnp.all(jnp.isfinite(preds)))
    print("KERNEL_OK")
</pallas_src>

<mosaic_0001>
module attributes {stable_mosaic.version = 11 : i64} {
  func.func @_embed_ln_kernel(%arg0: i32, %arg1: memref<8x32xf32, #tpu.memory_space<vmem>>, %arg2: memref<8x32xf32, #tpu.memory_space<vmem>>, %arg3: memref<1x32xf32, #tpu.memory_space<vmem>>, %arg4: memref<1x32xf32, #tpu.memory_space<vmem>>, %arg5: memref<8x32xbf16, #tpu.memory_space<vmem>>) attributes {dimension_semantics = [#tpu.dimension_semantics<parallel>], iteration_bounds = array<i64: 2>, scalar_prefetch = 0 : i64, scratch_operands = 0 : i64, tpu.core_type = #tpu.core_type<tc>, window_params = [{transform_indices = @transform_0, window_bounds = array<i64: 8, 32>}, {pipeline_mode = #tpu.pipeline_mode<synchronous>, transform_indices = @transform_1, window_bounds = array<i64: 8, 32>}, {pipeline_mode = #tpu.pipeline_mode<synchronous>, transform_indices = @transform_2, window_bounds = array<i64: 1, 32>}, {pipeline_mode = #tpu.pipeline_mode<synchronous>, transform_indices = @transform_3, window_bounds = array<i64: 1, 32>}, {transform_indices = @transform_4, window_bounds = array<i64: 8, 32>}]} {
    %c0 = arith.constant 0 : index
    %c0_0 = arith.constant 0 : index
    %0 = vector.load %arg1[%c0, %c0_0] : memref<8x32xf32, #tpu.memory_space<vmem>>, vector<8x32xf32>
    %c0_1 = arith.constant 0 : index
    %c0_2 = arith.constant 0 : index
    %1 = vector.load %arg2[%c0_1, %c0_2] : memref<8x32xf32, #tpu.memory_space<vmem>>, vector<8x32xf32>
    %2 = arith.addf %0, %1 : vector<8x32xf32>
    %c0_3 = arith.constant 0 : index
    %c0_4 = arith.constant 0 : index
    %3 = vector.load %arg3[%c0_3, %c0_4] : memref<1x32xf32, #tpu.memory_space<vmem>>, vector<1x32xf32>
    %c0_5 = arith.constant 0 : index
    %c0_6 = arith.constant 0 : index
    %4 = vector.load %arg4[%c0_5, %c0_6] : memref<1x32xf32, #tpu.memory_space<vmem>>, vector<1x32xf32>
    %cst = arith.constant dense<0.000000e+00> : vector<8xf32>
    %5 = vector.multi_reduction <add>, %2, %cst [1] : vector<8x32xf32> to vector<8xf32>
    %6 = vector.shape_cast %5 : vector<8xf32> to vector<8x1xf32>
    %cst_7 = arith.constant 3.200000e+01 : f32
    %7 = vector.broadcast %cst_7 : f32 to vector<8x1xf32>
    %8 = arith.divf %6, %7 : vector<8x1xf32>
    %9 = vector.broadcast %8 : vector<8x1xf32> to vector<8x32xf32>
    %10 = arith.subf %2, %9 : vector<8x32xf32>
    %11 = vector.broadcast %8 : vector<8x1xf32> to vector<8x32xf32>
    %12 = arith.subf %2, %11 : vector<8x32xf32>
    %13 = arith.mulf %10, %12 : vector<8x32xf32>
    %cst_8 = arith.constant dense<0.000000e+00> : vector<8xf32>
    %14 = vector.multi_reduction <add>, %13, %cst_8 [1] : vector<8x32xf32> to vector<8xf32>
    %15 = vector.shape_cast %14 : vector<8xf32> to vector<8x1xf32>
    %cst_9 = arith.constant 3.200000e+01 : f32
    %16 = vector.broadcast %cst_9 : f32 to vector<8x1xf32>
    %17 = arith.divf %15, %16 : vector<8x1xf32>
    %18 = vector.broadcast %8 : vector<8x1xf32> to vector<8x32xf32>
    %19 = arith.subf %2, %18 : vector<8x32xf32>
    %cst_10 = arith.constant 9.99999996E-13 : f32
    %20 = vector.broadcast %cst_10 : f32 to vector<8x1xf32>
    %21 = arith.addf %17, %20 : vector<8x1xf32>
    %22 = math.rsqrt %21 : vector<8x1xf32>
    %23 = vector.broadcast %22 : vector<8x1xf32> to vector<8x32xf32>
    %24 = arith.mulf %19, %23 : vector<8x32xf32>
    %25 = vector.broadcast %3 : vector<1x32xf32> to vector<8x32xf32>
    %26 = arith.mulf %24, %25 : vector<8x32xf32>
    %27 = vector.broadcast %4 : vector<1x32xf32> to vector<8x32xf32>
    %28 = arith.addf %26, %27 : vector<8x32xf32>
    %29 = arith.truncf %28 : vector<8x32xf32> to vector<8x32xbf16>
    %c0_11 = arith.constant 0 : index
    %c0_12 = arith.constant 0 : index
    %30 = vector.load %arg5[%c0_11, %c0_12] : memref<8x32xbf16, #tpu.memory_space<vmem>>, vector<8x32xbf16>
    tpu.vector_store %arg5[%c0_11, %c0_12], %29 {strides = array<i32>} : memref<8x32xbf16, #tpu.memory_space<vmem>>, vector<8x32xbf16>,
    return
  }
  func.func @transform_0(%arg0: i32) -> (i32, i32) {
    %c0_i32 = arith.constant 0 : i32
    %c0_i32_0 = arith.constant 0 : i32
    return %arg0, %c0_i32 : i32, i32
  }
  func.func @transform_1(%arg0: i32) -> (i32, i32) {
    %c0_i32 = arith.constant 0 : i32
    %c0_i32_0 = arith.constant 0 : i32
    %c0_i32_1 = arith.constant 0 : i32
    return %c0_i32, %c0_i32_0 : i32, i32
  }
  func.func @transform_2(%arg0: i32) -> (i32, i32) {
    %c0_i32 = arith.constant 0 : i32
    %c0_i32_0 = arith.constant 0 : i32
    %c0_i32_1 = arith.constant 0 : i32
    return %c0_i32, %c0_i32_0 : i32, i32
  }
  func.func @transform_3(%arg0: i32) -> (i32, i32) {
    %c0_i32 = arith.constant 0 : i32
    %c0_i32_0 = arith.constant 0 : i32
    %c0_i32_1 = arith.constant 0 : i32
    return %c0_i32, %c0_i32_0 : i32, i32
  }
  func.func @transform_4(%arg0: i32) -> (i32, i32) {
    %c0_i32 = arith.constant 0 : i32
    %c0_i32_0 = arith.constant 0 : i32
    return %arg0, %c0_i32 : i32, i32
  }
}

</mosaic_0001>

<bundles_post_ra>
// kernel: tpu_custom_call.1
= control target key start
LH: loop header
LB: loop body
LE: loop exit
PB: predicated region body
PF: predicated region fallthrough
CT: control target
= control target key end

     0   :  { %9 = vsyncpa [#allocation3], 0  ;;  %s798_s0 = inlined_call_operand.hbm [shape: f32[16,32], index: 0, kind: input, shape index: {}]   ;;  %s799_s1 = inlined_call_operand.hbm [shape: f32[8,32], index: 1, kind: input, shape index: {}]   ;;  %s800_s2 = inlined_call_operand.vmem [shape: f32[1,32], index: 2, kind: input, shape index: {}]   ;;  %s801_s3 = inlined_call_operand.vmem [shape: f32[1,32], index: 3, kind: input, shape index: {}]   ;;  %s802_s4 = inlined_call_operand.hbm [shape: bf16[16,32], index: 4, kind: output, shape index: {}]  }
   0x1   :  { %11 = vsyncpa [#allocation3 + $0x1], 0 }
   0x2   :  { %12 = vsyncpa [#allocation6], 0 }
   0x3   :  { %13 = vsyncpa [#allocation4], 0 }
   0x4   :  { %15 = vsyncpa [#allocation4 + $0x1], 0  ;;  %s590_s15 = smov 0   ;;  %s592_s16 = smov 0  }
   0x5   :  { %s594_s17 = smov 0   ;;  %s596_s18 = smov 0  }
   0x6 LB: > { %s611_s19 = sadd.s32 4294967295, %s560_s18   ;;  %s357_s20 = sadd.s32 4294967294, %s560_s18   ;;  %s560_s18 = sphi %s596_s18, %s826_s18   ;;  %s556_s17 = sphi %s594_s17, %s825_s17   ;;  %s552_s16 = sphi %s592_s16, %s824_s16   ;;  %s548_s15 = sphi %s590_s15, %s823_s15  }
   0x7   : > { %p41_p0 = scmp.ne.s32.totalorder %s552_s16, %s548_s15  ;;  %p803_p1 = scmp.eq.s32.totalorder %s611_s19, 0 }
   0x8   : > { %p134_p3 = scmp.eq.s32.totalorder %s357_s20, 1  ;;  %p358_p5 = scmp.ge.s32.totalorder %s560_s18, 1 }
   0x9   : > { %p620_p4 = por %p803_p1, %p41_p0  ;;  %p141_p7 = scmp.lt.s32.totalorder %s560_s18, 3 }
   0xa   : > { %p625_p6 = por %p134_p3, %p41_p0  ;;  %s562_s24 = smov [#allocation5]  }
   0xb   : > { %s806_s21 = scalar_select %p620_p4, 1, 0 }
   0xc   : > { %s807_s22 = scalar_select %p625_p6, 1, 0 }
   0xd   : > { %p630_p8 = pnand %p358_p5, %p141_p7  ;;  %s154_s25 = sshll.u32 %s562_s24, 4  ;;  %s155_s25 = int_to_ptr.vmem [resolvable:$true] %s154_s25 }
   0xe   : > { %s638_s26 = sadd.s32 1, %s560_s18   ;;  %s28_s30 = sadd.s32 1, %s556_s17 }
   0xf   : > { %s808_s23 = scalar_select %p630_p8, 1, 0 }
  0x10   : > { %p381_p10 = pneg %p630_p8  ;;  %s25_s28 = ssub.s32 %s560_s18, %s638_s26 }
  0x11   : > { %p648_p12 = scmp.eq.s32.totalorder %s25_s28, 0  ;;  %s432_s7 = scalar_lea.hbm %s799_s1, 128 }
  0x12   : > { %p642_p11 = pnand %p381_p10, %p803_p1  ;;  %p433_p0 = scmp.ne.s32.totalorder %s799_s1, %s432_s7 }
  0x13   : > { %s810_s29 = scalar_select %p648_p12, 1, 0 }
  0x14   : > { %p434_p3 = pneg %p642_p11  ;;  %p439_p10 = scmp.lt.u32.totalorder %s432_s7, %s799_s1 }
  0x16   : > { %p435_p5 = pnand %p434_p3, %p433_p0 }
  0x18   : > { %p436_p7 = pneg %p435_p5 }
  0x1a   : > { %p441_p9 = pnand %p439_p10, %p436_p7 }
  0x1c   : > { %444 = shalt.err (!%p441_p9)
}
  0x1d   : > { %s445_s12 = scalar_lea.vmem %s155_s25, 128  ;;  %p453_p6 = scmp.lt.s32.totalorder %s155_s25, %s155_s25 }
  0x1e   : > { %p446_p1 = scmp.ne.s32.totalorder %s155_s25, %s445_s12  ;;  %p454_p4 = scmp.lt.s32.totalorder %s445_s12, %s445_s12 }
  0x20   : > { %p448_p2 = pnand %p446_p1, %p434_p3  ;;  %p455_p8 = por %p454_p4, %p453_p6 }
  0x22   : > { %p449_p13 = pneg %p448_p2 }
  0x24   : > { %p456_p12 = pnand %p455_p8, %p449_p13 }
  0x26   : > { %459 = shalt.err (!%p456_p12)
}
  0x27   : > { %384 = dma.hbm_to_vmem [thread:$0]  (!%p642_p11), %s799_s1, 128, %s155_s25, [#allocation6]  }
  0x28   : > { %p811_p1 = scmp.ne.s32.totalorder %s810_s29, 0  ;;  %p36_p2 = scmp.eq.s32.totalorder %s560_s18, 0 }
  0x29   : > { %p812_p4 = scmp.ne.s32.totalorder %s556_s17, %s552_s16  ;;  %p813_p6 = scmp.eq.s32.totalorder %s611_s19, 1 }
  0x2a   : > { %s674_s20 = scalar_select %p811_p1, %s556_s17, %s28_s30  }
  0x2b   : > { %p682_p8 = por %p813_p6, %p812_p4  ;;  %p394_p9 = scmp.lt.s32.totalorder %s560_s18, 2 }
  0x2c   : > { %s171_s27 = sand.u32 1, %s556_s17   ;;  %p815_p12 = pmov %p812_p4 }
  0x2d   : > { %s361_s28 = sshll.u32 %s171_s27, 3  ;;  %s362_s5 = sshll.u32 %s560_s18, 7 }
  0x2e   : > { %p37_p13 = por %p36_p2, %p815_p12  ;;  %s695_s25 = scalar_lea.hbm %s798_s0, %s362_s5 }
  0x2f   : > { %s175_s29 = scalar_lea.vmem [#allocation2], %s361_s28  ;;  %s172_s9 = scalar_lea.sflag [#allocation3], %s171_s27 }
  0x30   : > { %s182_s30 = sshll.u32 %s175_s29, 4  ;;  %p697_p11 = pnand %p394_p9, %p37_p13  ;;  %s701_s30 = int_to_ptr.vmem [resolvable:$true] %s182_s30 }
  0x31   : > { %s460_s10 = scalar_lea.hbm %s695_s25, 128  ;;  %s465_s13 = scalar_lea.hbm %s798_s0, 256 }
  0x32   : > { %p461_p0 = scmp.ne.s32.totalorder %s695_s25, %s460_s10  ;;  %p462_p3 = pneg %p697_p11 }
  0x33   : > { %p466_p10 = scmp.lt.u32.totalorder %s695_s25, %s798_s0  ;;  %p467_p1 = scmp.lt.u32.totalorder %s465_s13, %s460_s10 }
  0x34   : > { %p463_p5 = pnand %p462_p3, %p461_p0  ;;  %p469_p4 = scmp.lt.u32.totalorder %s460_s10, %s695_s25 }
  0x35   : > { %p468_p2 = por %p467_p1, %p466_p10 }
  0x36   : > { %p464_p7 = pneg %p463_p5 }
  0x37   : > { %p470_p6 = por %p469_p4, %p468_p2 }
  0x39   : > { %p471_p9 = pnand %p470_p6, %p464_p7 }
  0x3b   : > { %474 = shalt.err (!%p471_p9)
}
  0x3c   : > { %s475_s27 = scalar_lea.vmem %s701_s30, 128  ;;  %s563_s5 = smov [#allocation2]  }
  0x3d   : > { %p476_p12 = scmp.ne.s32.totalorder %s701_s30, %s475_s27  ;;  %s480_s6 = sshll.u32 %s563_s5, 4  ;;  %s481_s6 = int_to_ptr.vmem [resolvable:$false] %s480_s6 }
  0x3e   : > { %s482_s7 = scalar_lea.vmem %s481_s6, 256  ;;  %p483_p5 = scmp.lt.s32.totalorder %s701_s30, %s481_s6 }
  0x3f   : > { %p478_p13 = pnand %p476_p12, %p462_p3  ;;  %p484_p10 = scmp.lt.s32.totalorder %s482_s7, %s475_s27 }
  0x41   : > { %p479_p0 = pneg %p478_p13  ;;  %p485_p1 = por %p484_p10, %p483_p5 }
  0x43   : > { %p486_p2 = pnand %p485_p1, %p479_p0 }
  0x45   : > { %489 = shalt.err (!%p486_p2)
}
  0x46   : > { %388 = dma.hbm_to_vmem [thread:$0]  (!%p697_p11), %s695_s25, 128, %s701_s30, %s172_s9  }
  0x47   : > { %p817_p7 = scmp.ne.s32.totalorder %s808_s23, 0 }
  0x48   : > { %s731_s29 = sand.u32 (!%p817_p7), 1, %s552_s16   ;;  %p818_p3 = scmp.ne.s32.totalorder (!%p817_p7), %s806_s21, 0 }
  0x49   : > { %191 = sbr.rel (%p817_p7) target bundleno = 416 (0x1a0), region = 36  ;;  %s364_s10 = sshll.u32 (!%p817_p7), %s731_s29, 3 }
  0x4a   : > { %s194_s11 = scalar_lea.sflag (!%p817_p7), [#allocation3], %s731_s29  ;;  %s197_s12 = scalar_lea.vmem (!%p817_p7), [#allocation2], %s364_s10 }
  0x50   : > { %535 = dma.done.wait (%p818_p3), %s194_s11, 128  }
  0x51   : > { %537 = vsyncadd (%p818_p3), %s194_s11, 4294967168  ;;  %p819_p4 = scmp.eq.s32.totalorder %s611_s19, 0 }
  0x53   : > { %539 = dma.done.wait (%p819_p4), [#allocation6], 128   ;;  %p820_p11 = pmov %p819_p4 }
  0x54   : > { %v226_v0 = vld [vmem:[%s197_s12] sm:$0xff]  ;;  %v227_v1 = vld [vmem:[#allocation5] sm:$0xff]  ;;  %vm231_vm0 = vcmask 261120   ;;  %s366_s21 = sshll.u32 %s731_s29, 2  ;;  %s370_s9 = sshll.u32 %s611_s19, 6  ;;  %vm261_vm1 = vcmask 257024  }
  0x55   : > { %541 = vsyncadd (%p820_p11), [#allocation6], 4294967168  ;;  %v228_v2 = vadd.f32 %v227_v1, %v226_v0  ;;  %v367_v13 = vld [vmem:[%s800_s2] ss:$0 sm:$0xff]  ;;  %s225_s13 = scalar_lea.vmem [#allocation7], %s366_s21  ;;  %s754_s5 = scalar_lea.hbm %s802_s4, %s370_s9 }
  0x56   : > { %v368_v15 = vld [vmem:[%s801_s3] ss:$0 sm:$0xff]  ;;  %s277_s14 = sshll.u32 %s225_s13, 4  ;;  %s264_s6 = scalar_lea.sflag [#allocation4], %s731_s29  ;;  %s756_s14 = int_to_ptr.vmem [resolvable:$true] %s277_s14 }
  0x57   : > { %v232_v3 = vsel %vm231_vm0, %v228_v2, 0.0  ;;  %s490_s7 = scalar_lea.vmem %s756_s14, 64  ;;  %s564_s19 = smov [#allocation7]  }
  0x58   : > { %233 = vadd.xlane.f32.xlu0 %v232_v3  ;;  %p491_p6 = scmp.ne.s32.totalorder %s756_s14, %s490_s7  ;;  %s494_s10 = sshll.u32 %s564_s19, 4  ;;  %s495_s10 = int_to_ptr.vmem [resolvable:$false] %s494_s10 }
  0x59   : > { %s496_s11 = scalar_lea.vmem %s495_s10, 128  ;;  %p497_p13 = scmp.lt.s32.totalorder %s756_s14, %s495_s10 }
  0x5a   : > { %p492_p9 = pnand %p491_p6, %p682_p8  ;;  %p498_p0 = scmp.lt.s32.totalorder %s496_s11, %s490_s7 }
  0x5c   : > { %p493_p12 = pneg %p492_p9  ;;  %p499_p5 = por %p498_p0, %p497_p13 }
  0x5e   : > { %p500_p10 = pnand %p499_p5, %p493_p12 }
  0xe5   : > { %v234_v4 = vpop.xlane.xlu0 %233 }
  0xe6   : > { %v236_v5 = vmul.f32 0.03125, %v234_v4 }
  0xe8   : > { %v237_v6 = vsub.f32 %v228_v2, %v236_v5 }
  0xea   : > { %v238_v7 = vmul.f32 %v237_v6, %v237_v6 }
  0xec   : > { %v239_v8 = vsel %vm231_vm0, %v238_v7, 0.0 }
  0xed   : > { %240 = vadd.xlane.f32.xlu0 %v239_v8 }
 0x17a   : > { %v241_v9 = vpop.xlane.xlu0 %240 }
 0x17b   : > { %v242_v10 = vmul.f32 0.03125, %v241_v9 }
 0x17d   : > { %v243_v11 = vadd.f32 1e-12, %v242_v10 }
 0x17f   : > { %430 = vrsqrt.f32 %v243_v11 }
 0x189   : > { %v431_v12 = vpop.eup %430 }
 0x18a   : > { %v245_v14 = vmul.f32 %v431_v12, %v237_v6 }
 0x18c   : > { %v252_v16 = vmul.f32 %v367_v13, %v245_v14 }
 0x18e   : > { %v259_v17 = vadd.f32 %v368_v15, %v252_v16 }
 0x190   : > { %v260_v18 = vpack.c.bf16 %v259_v17, %v259_v17 }
 0x192   : > { %262 = vst.msk [vmem:[%s225_s13] sm:$0xf] %vm261_vm1, %v260_v18 }
 0x193   : > { %503 = shalt.err (!%p500_p10)
}
 0x194   : > { %s504_s29 = scalar_lea.hbm %s754_s5, 64  ;;  %s508_s23 = scalar_lea.hbm %s802_s4, 128 }
 0x195   : > { %p505_p1 = scmp.ne.s32.totalorder %s754_s5, %s504_s29  ;;  %p509_p3 = scmp.lt.u32.totalorder %s754_s5, %s802_s4 }
 0x196   : > { %p510_p4 = scmp.lt.u32.totalorder %s508_s23, %s504_s29  ;;  %p512_p6 = scmp.lt.u32.totalorder %s504_s29, %s754_s5 }
 0x197   : > { %p506_p2 = pnand %p505_p1, %p682_p8 }
 0x198   : > { %p511_p11 = por %p510_p4, %p509_p3 }
 0x199   : > { %p507_p7 = pneg %p506_p2 }
 0x19a   : > { %p513_p9 = por %p512_p6, %p511_p11 }
 0x19c   : > { %p514_p12 = pnand %p513_p9, %p507_p7 }
 0x19e   : > { %517 = shalt.err (!%p514_p12)
}
 0x19f   : > { %379 = dma.vmem_to_hbm [thread:$0]  (%p682_p8), %s756_s14, 64, %s754_s5, %s264_s6  }
 0x1a0 PF: > { %s289_s8 = sand.u32 1, %s548_s15   ;;  %p821_p13 = scmp.ne.s32.totalorder %s807_s22, 0 }
 0x1a1   : > { %p822_p0 = scmp.ge.s32.totalorder %s560_s18, 2  ;;  %s290_s9 = scalar_lea.sflag [#allocation4], %s289_s8 }
 0x1a3   : > { %p390_p5 = pnand %p822_p0, %p821_p13 }
 0x1a5   : > { %543 = dma.done.wait (!%p390_p5), %s290_s9, 64  }
 0x1a6   : > { %545 = vsyncadd (!%p390_p5), %s290_s9, 4294967232  ;;  %p18_p10 = scmp.ge.s32.totalorder %s638_s26, 4   ;;  %s823_s15 = smov %s552_s16 }
 0x1a7   : > { %s824_s16 = smov %s556_s17  ;;  %s825_s17 = smov %s674_s20 }
 0x1a8   : > { %s826_s18 = smov %s638_s26  ;;  %20 = sbr.rel (!%p18_p10) target bundleno = 6 (0x6), region = 85 }
 0x1af   :  { %295 = vsyncpa [#allocation3], 1 }
 0x1b0   :  { %297 = vsyncpa [#allocation3 + $0x1], 1 }
 0x1b1   :  { %298 = vsyncpa [#allocation6], 1 }
 0x1b2   :  { %299 = vsyncpa [#allocation4], 1 }
 0x1b3   :  { %301 = vsyncpa [#allocation4 + $0x1], 1 }

</bundles_post_ra>
